<compile_context>
chip_gen: v6e
topology: v6e:2x2x1
jax: 0.10.0
libtpu: 0.0.40
codegen_flags: <defaults>
</compile_context>

<pallas_src>
import jax
import jax.numpy as jnp
from jax.experimental import pallas as pl
from jax.experimental.pallas import tpu as pltpu

OUT_PAD = 128  # lane-dense padded width for the fc3 output


def dqn_forward_kernel(x_ref, w1_ref, b1_ref, w2_ref, b2_ref, w3_ref, b3_ref,
                       o_ref):
    """One batch tile: fc1 (VPU) -> ReLU -> fc2 (MXU) -> ReLU -> fc3 (MXU)."""
    x = x_ref[...]            # (TB, K) f32
    w1 = w1_ref[...]          # (K, 512) f32  (tiny; VPU path)
    k_dim = w1.shape[0]

    # fc1 on the VPU: K is tiny (4), so unroll the contraction as broadcast
    # multiply-adds instead of paying an MXU push/drain for a K=4 matmul.
    h1 = x[:, 0:1] * w1[0:1, :]
    for k in range(1, k_dim):
        h1 = h1 + x[:, k:k + 1] * w1[k:k + 1, :]
    h1 = jnp.maximum(h1 + b1_ref[...], 0.0)          # f32 elementwise

    # fc2 on the MXU: bf16 operands, f32 accumulation.
    h2 = jnp.dot(h1.astype(jnp.bfloat16), w2_ref[...],
                 preferred_element_type=jnp.float32)
    h2 = jnp.maximum(h2 + b2_ref[...], 0.0)          # f32 elementwise

    # fc3 on the MXU (output lane-padded to 128; no activation).
    out = jnp.dot(h2.astype(jnp.bfloat16), w3_ref[...],
                  preferred_element_type=jnp.float32)
    out = out + b3_ref[...]

    o_ref[...] = out.astype(o_ref.dtype)


def dqn_forward(x, params):
    """x: (B, 4) float32; params: dict of f32 weights/biases. Returns (B, 2)."""
    w1 = params["w1"].astype(jnp.float32)     # (4, 512)   stays f32 (tiny, VPU)
    b1 = params["b1"].astype(jnp.float32)     # (1, 512)
    w2 = params["w2"].astype(jnp.bfloat16)    # (512, 512) bf16 halves HBM DMA
    b2 = params["b2"].astype(jnp.float32)     # (1, 512)
    w3 = params["w3"]                         # (512, A)
    b3 = params["b3"]                         # (1, A)

    B, K = x.shape
    H = w2.shape[0]
    A = w3.shape[1]

    # Lane-pad fc3 to 128 outputs so the kernel's stores are unmasked.
    w3p = jnp.zeros((H, OUT_PAD), jnp.float32).at[:, :A].set(w3)
    w3p = w3p.astype(jnp.bfloat16)
    b3p = jnp.zeros((1, OUT_PAD), jnp.float32).at[:, :A].set(b3)

    # Batch tiling: single padded tile for small B, 256-row tiles otherwise
    # (matches the 256-wide MXU on v6e/v7x and lets megacore shard tiles).
    B8 = -(-B // 8) * 8
    TB = 256 if B8 >= 256 else B8
    B_pad = -(-B8 // TB) * TB
    nb = B_pad // TB
    if B_pad != B:
        x = jnp.pad(x, ((0, B_pad - B), (0, 0)))

    # TODO(synk): for per-env-step inference (B=8 every call) the remaining
    # cost is launch overhead + re-DMA of ~0.5 MiB of weights; amortize by
    # batching states per call or cross-call weight prefetch (P10).
    out = pl.pallas_call(
        dqn_forward_kernel,
        out_shape=jax.ShapeDtypeStruct((B_pad, OUT_PAD), jnp.float32),
        grid=(nb,),
        in_specs=[
            pl.BlockSpec((TB, K), lambda i: (i, 0)),        # x tile
            pl.BlockSpec((K, H), lambda i: (0, 0)),         # w1 (resident)
            pl.BlockSpec((1, H), lambda i: (0, 0)),         # b1
            pl.BlockSpec((H, H), lambda i: (0, 0)),         # w2 (resident)
            pl.BlockSpec((1, H), lambda i: (0, 0)),         # b2
            pl.BlockSpec((H, OUT_PAD), lambda i: (0, 0)),   # w3 padded
            pl.BlockSpec((1, OUT_PAD), lambda i: (0, 0)),   # b3 padded
        ],
        out_specs=pl.BlockSpec((TB, OUT_PAD), lambda i: (i, 0)),
        compiler_params=pltpu.CompilerParams(
            dimension_semantics=("parallel",)),
    )(x, w1, b1, w2, b2, w3p, b3p)

    return out[:B, :A]


def init_params(key):
    """Synthetic init mirroring nn.Linear default U(-1/sqrt(fan_in), +)."""
    state_size, stack_frame, action_size = 4, 1, 2
    input_size = state_size * stack_frame
    dims = [(input_size, 512), (512, 512), (512, action_size)]
    params = {}
    for i, (fan_in, fan_out) in enumerate(dims, start=1):
        key, kw, kb = jax.random.split(key, 3)
        bound = 1.0 / jnp.sqrt(jnp.float32(fan_in))
        # stored as (in, out) => kernel does x @ W
        params[f"w{i}"] = jax.random.uniform(
            kw, (fan_in, fan_out), jnp.float32, -bound, bound)
        params[f"b{i}"] = jax.random.uniform(
            kb, (1, fan_out), jnp.float32, -bound, bound)
    return params


def dqn_forward_ref(x, params):
    """JAX reference mirroring the kernel's bf16 weight/activation casts."""
    h1 = jnp.maximum(x @ params["w1"] + params["b1"], 0.0)
    h2 = jnp.dot(h1.astype(jnp.bfloat16), params["w2"].astype(jnp.bfloat16),
                 preferred_element_type=jnp.float32)
    h2 = jnp.maximum(h2 + params["b2"], 0.0)
    out = jnp.dot(h2.astype(jnp.bfloat16), params["w3"].astype(jnp.bfloat16),
                  preferred_element_type=jnp.float32)
    return out + params["b3"]


def dqn_forward_ref_f32(x, params):
    """Pure-f32 reference (matches the original PyTorch module numerics)."""
    h1 = jnp.maximum(x @ params["w1"] + params["b1"], 0.0)
    h2 = jnp.maximum(h1 @ params["w2"] + params["b2"], 0.0)
    return h2 @ params["w3"] + params["b3"]


if __name__ == "__main__":
    key = jax.random.PRNGKey(0)
    key, kx = jax.random.split(key)

    batch = 8
    state_size, stack_frame = 4, 1
    x = jax.random.normal(kx, (batch, state_size * stack_frame), jnp.float32)

    params = init_params(key)

    out = dqn_forward(x, params)
    out = jax.block_until_ready(out)

    ref_bf16 = dqn_forward_ref(x, params)
    ref_f32 = dqn_forward_ref_f32(x, params)

    assert out.shape == (batch, 2)
    # Tight check against the bf16-mirroring reference.
    assert jnp.allclose(out, ref_bf16, atol=1e-2, rtol=1e-2), \
        "mismatch vs bf16 JAX reference"
    # Looser sanity check against the full-f32 module semantics.
    assert jnp.allclose(out, ref_f32, atol=5e-2, rtol=5e-2), \
        "mismatch vs f32 JAX reference"

    print("KERNEL_OK")
</pallas_src>

<mosaic_0001>
module attributes {stable_mosaic.version = 11 : i64} {
  func.func @dqn_forward_kernel(%arg0: i32, %arg1: memref<8x4xf32, #tpu.memory_space<vmem>>, %arg2: memref<4x512xf32, #tpu.memory_space<vmem>>, %arg3: memref<1x512xf32, #tpu.memory_space<vmem>>, %arg4: memref<512x512xbf16, #tpu.memory_space<vmem>>, %arg5: memref<1x512xf32, #tpu.memory_space<vmem>>, %arg6: memref<512x128xbf16, #tpu.memory_space<vmem>>, %arg7: memref<1x128xf32, #tpu.memory_space<vmem>>, %arg8: memref<8x128xf32, #tpu.memory_space<vmem>>) attributes {dimension_semantics = [#tpu.dimension_semantics<parallel>], iteration_bounds = array<i64: 1>, scalar_prefetch = 0 : i64, scratch_operands = 0 : i64, tpu.core_type = #tpu.core_type<tc>, window_params = [{transform_indices = @transform_0, window_bounds = array<i64: 8, 4>}, {pipeline_mode = #tpu.pipeline_mode<synchronous>, transform_indices = @transform_1, window_bounds = array<i64: 4, 512>}, {pipeline_mode = #tpu.pipeline_mode<synchronous>, transform_indices = @transform_2, window_bounds = array<i64: 1, 512>}, {pipeline_mode = #tpu.pipeline_mode<synchronous>, transform_indices = @transform_3, window_bounds = array<i64: 512, 512>}, {pipeline_mode = #tpu.pipeline_mode<synchronous>, transform_indices = @transform_4, window_bounds = array<i64: 1, 512>}, {pipeline_mode = #tpu.pipeline_mode<synchronous>, transform_indices = @transform_5, window_bounds = array<i64: 512, 128>}, {pipeline_mode = #tpu.pipeline_mode<synchronous>, transform_indices = @transform_6, window_bounds = array<i64: 1, 128>}, {transform_indices = @transform_7, window_bounds = array<i64: 8, 128>}]} {
    %c0 = arith.constant 0 : index
    %c0_0 = arith.constant 0 : index
    %0 = vector.load %arg1[%c0, %c0_0] : memref<8x4xf32, #tpu.memory_space<vmem>>, vector<8x4xf32>
    %c0_1 = arith.constant 0 : index
    %c0_2 = arith.constant 0 : index
    %1 = vector.load %arg2[%c0_1, %c0_2] : memref<4x512xf32, #tpu.memory_space<vmem>>, vector<4x512xf32>
    %2 = vector.extract_strided_slice %0 {offsets = [0, 0], sizes = [8, 1], strides = [1, 1]} : vector<8x4xf32> to vector<8x1xf32>
    %3 = vector.extract_strided_slice %1 {offsets = [0, 0], sizes = [1, 512], strides = [1, 1]} : vector<4x512xf32> to vector<1x512xf32>
    %4 = vector.broadcast %2 : vector<8x1xf32> to vector<8x512xf32>
    %5 = vector.broadcast %3 : vector<1x512xf32> to vector<8x512xf32>
    %6 = arith.mulf %4, %5 : vector<8x512xf32>
    %7 = vector.extract_strided_slice %0 {offsets = [0, 1], sizes = [8, 1], strides = [1, 1]} : vector<8x4xf32> to vector<8x1xf32>
    %8 = vector.extract_strided_slice %1 {offsets = [1, 0], sizes = [1, 512], strides = [1, 1]} : vector<4x512xf32> to vector<1x512xf32>
    %9 = vector.broadcast %7 : vector<8x1xf32> to vector<8x512xf32>
    %10 = vector.broadcast %8 : vector<1x512xf32> to vector<8x512xf32>
    %11 = arith.mulf %9, %10 : vector<8x512xf32>
    %12 = arith.addf %6, %11 : vector<8x512xf32>
    %13 = vector.extract_strided_slice %0 {offsets = [0, 2], sizes = [8, 1], strides = [1, 1]} : vector<8x4xf32> to vector<8x1xf32>
    %14 = vector.extract_strided_slice %1 {offsets = [2, 0], sizes = [1, 512], strides = [1, 1]} : vector<4x512xf32> to vector<1x512xf32>
    %15 = vector.broadcast %13 : vector<8x1xf32> to vector<8x512xf32>
    %16 = vector.broadcast %14 : vector<1x512xf32> to vector<8x512xf32>
    %17 = arith.mulf %15, %16 : vector<8x512xf32>
    %18 = arith.addf %12, %17 : vector<8x512xf32>
    %19 = vector.extract_strided_slice %0 {offsets = [0, 3], sizes = [8, 1], strides = [1, 1]} : vector<8x4xf32> to vector<8x1xf32>
    %20 = vector.extract_strided_slice %1 {offsets = [3, 0], sizes = [1, 512], strides = [1, 1]} : vector<4x512xf32> to vector<1x512xf32>
    %21 = vector.broadcast %19 : vector<8x1xf32> to vector<8x512xf32>
    %22 = vector.broadcast %20 : vector<1x512xf32> to vector<8x512xf32>
    %23 = arith.mulf %21, %22 : vector<8x512xf32>
    %24 = arith.addf %18, %23 : vector<8x512xf32>
    %c0_3 = arith.constant 0 : index
    %c0_4 = arith.constant 0 : index
    %25 = vector.load %arg3[%c0_3, %c0_4] : memref<1x512xf32, #tpu.memory_space<vmem>>, vector<1x512xf32>
    %26 = vector.broadcast %25 : vector<1x512xf32> to vector<8x512xf32>
    %27 = arith.addf %24, %26 : vector<8x512xf32>
    %cst = arith.constant 0.000000e+00 : f32
    %28 = vector.broadcast %cst : f32 to vector<8x512xf32>
    %29 = arith.maximumf %27, %28 : vector<8x512xf32>
    %30 = arith.truncf %29 : vector<8x512xf32> to vector<8x512xbf16>
    %c0_5 = arith.constant 0 : index
    %c0_6 = arith.constant 0 : index
    %31 = vector.load %arg4[%c0_5, %c0_6] : memref<512x512xbf16, #tpu.memory_space<vmem>>, vector<512x512xbf16>
    %cst_7 = arith.constant dense<0.000000e+00> : vector<8x512xf32>
    %32 = tpu.matmul %30, %31, %cst_7 {dimension_numbers = #tpu.dot_dimension_numbers<[1], [0], [0], [1], [0, 0, 1, 1], [], []>} : vector<8x512xbf16>, vector<512x512xbf16>, vector<8x512xf32> -> vector<8x512xf32>
    %c0_8 = arith.constant 0 : index
    %c0_9 = arith.constant 0 : index
    %33 = vector.load %arg5[%c0_8, %c0_9] : memref<1x512xf32, #tpu.memory_space<vmem>>, vector<1x512xf32>
    %34 = vector.broadcast %33 : vector<1x512xf32> to vector<8x512xf32>
    %35 = arith.addf %32, %34 : vector<8x512xf32>
    %cst_10 = arith.constant 0.000000e+00 : f32
    %36 = vector.broadcast %cst_10 : f32 to vector<8x512xf32>
    %37 = arith.maximumf %35, %36 : vector<8x512xf32>
    %38 = arith.truncf %37 : vector<8x512xf32> to vector<8x512xbf16>
    %c0_11 = arith.constant 0 : index
    %c0_12 = arith.constant 0 : index
    %39 = vector.load %arg6[%c0_11, %c0_12] : memref<512x128xbf16, #tpu.memory_space<vmem>>, vector<512x128xbf16>
    %cst_13 = arith.constant dense<0.000000e+00> : vector<8x128xf32>
    %40 = tpu.matmul %38, %39, %cst_13 {dimension_numbers = #tpu.dot_dimension_numbers<[1], [0], [0], [1], [0, 0, 1, 1], [], []>} : vector<8x512xbf16>, vector<512x128xbf16>, vector<8x128xf32> -> vector<8x128xf32>
    %c0_14 = arith.constant 0 : index
    %c0_15 = arith.constant 0 : index
    %41 = vector.load %arg7[%c0_14, %c0_15] : memref<1x128xf32, #tpu.memory_space<vmem>>, vector<1x128xf32>
    %42 = vector.broadcast %41 : vector<1x128xf32> to vector<8x128xf32>
    %43 = arith.addf %40, %42 : vector<8x128xf32>
    %c0_16 = arith.constant 0 : index
    %c0_17 = arith.constant 0 : index
    %44 = vector.load %arg8[%c0_16, %c0_17] : memref<8x128xf32, #tpu.memory_space<vmem>>, vector<8x128xf32>
    tpu.vector_store %arg8[%c0_16, %c0_17], %43 {strides = array<i32>} : memref<8x128xf32, #tpu.memory_space<vmem>>, vector<8x128xf32>,
    return
  }
  func.func @transform_0(%arg0: i32) -> (i32, i32) {
    %c0_i32 = arith.constant 0 : i32
    %c0_i32_0 = arith.constant 0 : i32
    return %arg0, %c0_i32 : i32, i32
  }
  func.func @transform_1(%arg0: i32) -> (i32, i32) {
    %c0_i32 = arith.constant 0 : i32
    %c0_i32_0 = arith.constant 0 : i32
    %c0_i32_1 = arith.constant 0 : i32
    return %c0_i32, %c0_i32_0 : i32, i32
  }
  func.func @transform_2(%arg0: i32) -> (i32, i32) {
    %c0_i32 = arith.constant 0 : i32
    %c0_i32_0 = arith.constant 0 : i32
    %c0_i32_1 = arith.constant 0 : i32
    return %c0_i32, %c0_i32_0 : i32, i32
  }
  func.func @transform_3(%arg0: i32) -> (i32, i32) {
    %c0_i32 = arith.constant 0 : i32
    %c0_i32_0 = arith.constant 0 : i32
    %c0_i32_1 = arith.constant 0 : i32
    return %c0_i32, %c0_i32_0 : i32, i32
  }
  func.func @transform_4(%arg0: i32) -> (i32, i32) {
    %c0_i32 = arith.constant 0 : i32
    %c0_i32_0 = arith.constant 0 : i32
    %c0_i32_1 = arith.constant 0 : i32
    return %c0_i32, %c0_i32_0 : i32, i32
  }
  func.func @transform_5(%arg0: i32) -> (i32, i32) {
    %c0_i32 = arith.constant 0 : i32
    %c0_i32_0 = arith.constant 0 : i32
    %c0_i32_1 = arith.constant 0 : i32
    return %c0_i32, %c0_i32_0 : i32, i32
  }
  func.func @transform_6(%arg0: i32) -> (i32, i32) {
    %c0_i32 = arith.constant 0 : i32
    %c0_i32_0 = arith.constant 0 : i32
    %c0_i32_1 = arith.constant 0 : i32
    return %c0_i32, %c0_i32_0 : i32, i32
  }
  func.func @transform_7(%arg0: i32) -> (i32, i32) {
    %c0_i32 = arith.constant 0 : i32
    %c0_i32_0 = arith.constant 0 : i32
    return %arg0, %c0_i32 : i32, i32
  }
}

</mosaic_0001>

<bundles_post_ra>
// kernel: tpu_custom_call.1
= control target key start
LH: loop header
LB: loop body
LE: loop exit
PB: predicated region body
PF: predicated region fallthrough
CT: control target
= control target key end

     0   :  { %12 = vsyncpa [#allocation3], 0  ;;  %s2273_s0 = inlined_call_operand.vmem [shape: f32[8,4], index: 0, kind: input, shape index: {}]   ;;  %s2274_s1 = inlined_call_operand.hbm [shape: f32[4,512], index: 1, kind: input, shape index: {}]   ;;  %s2275_s2 = inlined_call_operand.vmem [shape: f32[1,512], index: 2, kind: input, shape index: {}]   ;;  %s2276_s3 = inlined_call_operand.hbm [shape: bf16[512,512], index: 3, kind: input, shape index: {}]   ;;  %s2277_s4 = inlined_call_operand.vmem [shape: f32[1,512], index: 4, kind: input, shape index: {}]   ;;  %s2278_s5 = inlined_call_operand.hbm [shape: bf16[512,128], index: 5, kind: input, shape index: {}]   ;;  %s2279_s6 = inlined_call_operand.vmem [shape: f32[1,128], index: 6, kind: input, shape index: {}]   ;;  %s2280_s7 = inlined_call_operand.hbm [shape: f32[8,128], index: 7, kind: output, shape index: {}]  }
   0x1   :  { %13 = vsyncpa [#allocation6], 0 }
   0x2   :  { %14 = vsyncpa [#allocation4], 0  ;;  %s2149_s24 = smov [#allocation5]  }
   0x3   :  { %s34_s25 = sshll.u32 %s2149_s24, 4  ;;  %s35_s25 = int_to_ptr.vmem [resolvable:$true] %s34_s25 }
   0x4   :  { %s2071_s26 = scalar_lea.vmem %s35_s25, 16384  ;;  %p2076_p1 = scmp.lt.s32.totalorder %s35_s25, %s35_s25 }
   0x5   :  { %p2072_p0 = scmp.ne.s32.totalorder %s35_s25, %s2071_s26  ;;  %p2077_p2 = scmp.lt.s32.totalorder %s2071_s26, %s2071_s26 }
   0x7   :  { %p2078_p3 = por %p2077_p2, %p2076_p1 }
   0x9   :  { %p2079_p4 = pnand %p2078_p3, %p2072_p0 }
   0xb   :  { %2082 = shalt.err (!%p2079_p4)
}
   0xc   :  { %s2150_s27 = smov 256   ;;  %s2151_s28 = smov 16  }
   0xd   :  { %40 = dma.hbm_to_vmem [thread:$0]  %s2276_s3, 16384, %s35_s25, [#allocation6], %s2150_s27, %s2150_s27, %s2151_s28  }
   0xe   :  { %s2152_s8 = smov [#allocation2]   ;;  %s2153_s10 = smov [#allocation7]  }
   0xf   :  { %s23_s9 = sshll.u32 %s2152_s8, 4  ;;  %s48_s11 = sshll.u32 %s2153_s10, 4  ;;  %s24_s9 = int_to_ptr.vmem [resolvable:$true] %s23_s9  ;;  %s49_s11 = int_to_ptr.vmem [resolvable:$true] %s48_s11 }
  0x10   :  { %s2091_s12 = scalar_lea.vmem %s24_s9, 256  ;;  %p2096_p6 = scmp.lt.s32.totalorder %s24_s9, %s24_s9 }
  0x11   :  { %p2092_p5 = scmp.ne.s32.totalorder %s24_s9, %s2091_s12  ;;  %p2097_p7 = scmp.lt.s32.totalorder %s2091_s12, %s2091_s12 }
  0x13   :  { %p2098_p8 = por %p2097_p7, %p2096_p6 }
  0x15   :  { %p2099_p9 = pnand %p2098_p8, %p2092_p5 }
  0x17   :  { %2102 = shalt.err (!%p2099_p9)
}
  0x18   :  { %26 = dma.hbm_to_vmem [thread:$0]  %s2274_s1, 256, %s24_s9, [#allocation3]  }
  0x19   :  { %s2111_s15 = scalar_lea.vmem %s49_s11, 4096  ;;  %p2116_p11 = scmp.lt.s32.totalorder %s49_s11, %s49_s11 }
  0x1a   :  { %p2112_p10 = scmp.ne.s32.totalorder %s49_s11, %s2111_s15  ;;  %p2117_p12 = scmp.lt.s32.totalorder %s2111_s15, %s2111_s15 }
  0x1c   :  { %p2118_p13 = por %p2117_p12, %p2116_p11 }
  0x1e   :  { %p2119_p0 = pnand %p2118_p13, %p2112_p10 }
  0x20   :  { %2122 = shalt.err (!%p2119_p0)
}
  0x21   :  { %s2154_s3 = smov 64   ;;  %s2155_s16 = smov 4  }
  0x22   :  { %54 = dma.hbm_to_vmem [thread:$0]  %s2278_s5, 4096, %s49_s11, [#allocation6], %s2154_s3, %s2154_s3, %s2155_s16  }
  0x23   :  { %2143 = dma.done.wait [#allocation3], 256  }
  0x24   :  { %2144 = vsyncadd [#allocation3], 4294967040 }
  0x25   :  { %2145 = dma.done.wait [#allocation6], 20480  }
  0x26   :  { %2146 = vsyncadd [#allocation6], 4294946816  ;;  %v2156_v0 = vmov 0   ;;  %v2157_v1 = vmov 2   ;;  %v67_v2 = vld [vmem:[%s2273_s0] sm:$0xff]  ;;  %v2158_v9 = vmov 1  }
  0x27   :  { %1834 = vset.pattern.permute.xlu0 %v2156_v0  ;;  %1836 = vset.pattern.permute.xlu1 %v2157_v1  ;;  %v1839_v3 = vld [vmem:[#allocation5 + $0xe4] ss:$16 sps:$4 sm:$0xff]   ;;  %v1843_v5 = vld [vmem:[#allocation5 + $0xe0] ss:$16 sps:$4 sm:$0xff]   ;;  %v2159_v10 = vmov 3   ;;  %s2160_s22 = smov [#allocation8]  }
  0x28   :  { %72 = vperm.xlu0 %1834, %v67_v2   ;;  %166 = vperm.xlu1 %1836, %v67_v2   ;;  %v1841_v4 = vld [vmem:[#allocation5 + $0x2e4] ss:$16 sps:$4 sm:$0xff]   ;;  %v1844_v6 = vld [vmem:[#allocation5 + $0x2e0] ss:$16 sps:$4 sm:$0xff]   ;;  %s1607_s23 = sshll.u32 %s2160_s22, 4  ;;  %s1608_s23 = int_to_ptr.vmem [resolvable:$true] %s1607_s23 }
  0x29   :  { %1085 = vmatprep.subr.bf16.mxu0 %v1839_v3  ;;  %v1845_v7 = vld [vmem:[#allocation5 + $0xc4] ss:$16 sps:$4 sm:$0xff]   ;;  %1126 = vmatprep.subr.bf16.mxu1 %v1841_v4  ;;  %v1849_v11 = vld [vmem:[#allocation5 + $0xc0] ss:$16 sps:$4 sm:$0xff]   ;;  %v1937_v4 = vld [vmem:[#allocation5 + $0xec] ss:$16 sps:$4 sm:$0xff]   ;;  %p2128_p2 = scmp.lt.s32.totalorder %s1608_s23, %s1608_s23 }
  0x2a   :  { %1086 = vmatpush1.bf16.msra.mxu0 %v1843_v5  ;;  %v1847_v8 = vld [vmem:[#allocation5 + $0x2c4] ss:$16 sps:$4 sm:$0xff]   ;;  %1127 = vmatpush1.bf16.msra.mxu1 %v1844_v6  ;;  %v1850_v13 = vld [vmem:[#allocation5 + $0x2c0] ss:$16 sps:$4 sm:$0xff]   ;;  %v1940_v6 = vld [vmem:[#allocation5 + $0x2ec] ss:$16 sps:$4 sm:$0xff]  }
  0x2b   :  { %v1851_v12 = vld [vmem:[#allocation5 + $0xa4] ss:$16 sps:$4 sm:$0xff]   ;;  %1087 = vmatprep.subr.bf16.mxu0 %v1845_v7  ;;  %1128 = vmatprep.subr.bf16.mxu1 %v1847_v8  ;;  %v1855_v15 = vld [vmem:[#allocation5 + $0xa0] ss:$16 sps:$4 sm:$0xff]   ;;  %v77_v7 = vlaneseq  ;;  %s2123_s24 = scalar_lea.vmem %s1608_s23, 128 }
  0x2c   :  { %1835 = vset.pattern.permute.xlu0 %v2158_v9  ;;  %1837 = vset.pattern.permute.xlu1 %v2159_v10  ;;  %v1853_v14 = vld [vmem:[#allocation5 + $0x2a4] ss:$16 sps:$4 sm:$0xff]   ;;  %v1856_v17 = vld [vmem:[#allocation5 + $0x2a0] ss:$16 sps:$4 sm:$0xff]   ;;  %p2124_p1 = scmp.ne.s32.totalorder %s1608_s23, %s2123_s24  ;;  %p2129_p3 = scmp.lt.s32.totalorder %s2123_s24, %s2123_s24 }
  0x2d   :  { %118 = vperm.xlu0 %1835, %v67_v2   ;;  %214 = vperm.xlu1 %1837, %v67_v2   ;;  %v1857_v16 = vld [vmem:[#allocation5 + $0x84] ss:$16 sps:$4 sm:$0xff]   ;;  %v1861_v19 = vld [vmem:[#allocation5 + $0x80] ss:$16 sps:$4 sm:$0xff]   ;;  %v78_v8 = vshrl.u32 %v77_v7, 7 }
  0x2e   :  { %1088 = vmatpush1.bf16.msra.mxu0 %v1849_v11  ;;  %1129 = vmatpush1.bf16.msra.mxu1 %v1850_v13  ;;  %v1859_v18 = vld [vmem:[#allocation5 + $0x284] ss:$16 sps:$4 sm:$0xff]   ;;  %v1862_v21 = vld [vmem:[#allocation5 + $0x280] ss:$16 sps:$4 sm:$0xff]   ;;  %p2130_p4 = por %p2129_p3, %p2128_p2 }
  0x2f   :  { %1089 = vmatprep.subr.bf16.mxu0 %v1851_v12  ;;  %1130 = vmatprep.subr.bf16.mxu1 %v1853_v14  ;;  %v1863_v20 = vld [vmem:[#allocation5 + $0x64] ss:$16 sps:$4 sm:$0xff]   ;;  %v1867_v23 = vld [vmem:[#allocation5 + $0x60] ss:$16 sps:$4 sm:$0xff]   ;;  %v2213_v9 = vsub.s32 0, %v78_v8  ;;  %v69_v12 = vld [vmem:[#allocation2 + $0x8] sm:$0xff] }
  0x30   :  { %v1865_v22 = vld [vmem:[#allocation5 + $0x264] ss:$16 sps:$4 sm:$0xff]   ;;  %v1868_v25 = vld [vmem:[#allocation5 + $0x260] ss:$16 sps:$4 sm:$0xff]   ;;  %v2215_v13 = vsub.s32 2, %v78_v8  ;;  %v175_v14 = vsub.s32 6, %v78_v8  ;;  %p2131_p5 = pnand %p2130_p4, %p2124_p1 }
  0x31   :  { %1838 = vset.pattern.permute.xlu0 %v2159_v10  ;;  %v1869_v24 = vld [vmem:[#allocation5 + $0x44] ss:$16 sps:$4 sm:$0xff]   ;;  %v1873_v27 = vld [vmem:[#allocation5 + $0x40] ss:$16 sps:$4 sm:$0xff]   ;;  %v83_v10 = vsub.s32 4, %v78_v8 }
  0x32   :  { %1090 = vmatpush1.bf16.msra.mxu0 %v1855_v15  ;;  %1131 = vmatpush1.bf16.msra.mxu1 %v1856_v17  ;;  %v1871_v26 = vld [vmem:[#allocation5 + $0x244] ss:$16 sps:$4 sm:$0xff]   ;;  %v1874_v29 = vld [vmem:[#allocation5 + $0x240] ss:$16 sps:$4 sm:$0xff]   ;;  %v2217_v15 = vsub.s32 1, %v78_v8  ;;  %v2219_v17 = vsub.s32 3, %v78_v8 }
  0x33   :  { %1091 = vmatprep.subr.bf16.mxu0 %v1857_v16  ;;  %1132 = vmatprep.subr.bf16.mxu1 %v1859_v18  ;;  %v1875_v28 = vld [vmem:[#allocation5 + $0x24] ss:$16 sps:$4 sm:$0xff]   ;;  %v1879_v31 = vld [vmem:[#allocation5 + $0x20] ss:$16 sps:$4 sm:$0xff]   ;;  %v127_v16 = vsub.s32 5, %v78_v8  ;;  %v223_v18 = vsub.s32 7, %v78_v8 }
  0x34   :  { %v1877_v30 = vld [vmem:[#allocation5 + $0x224] ss:$16 sps:$4 sm:$0xff]   ;;  %v1880_v33 = vld [vmem:[#allocation5 + $0x220] ss:$16 sps:$4 sm:$0xff]  }
  0x35   :  { %v1881_v32 = vld [vmem:[#allocation5 + $0x4] ss:$16 sps:$4 sm:$0xff]   ;;  %v1885_v35 = vld [vmem:[#allocation5] ss:$16 sps:$4 sm:$0xff]  }
  0x36   :  { %1092 = vmatpush1.bf16.msra.mxu0 %v1861_v19  ;;  %1133 = vmatpush1.bf16.msra.mxu1 %v1862_v21  ;;  %v1883_v34 = vld [vmem:[#allocation5 + $0x204] ss:$16 sps:$4 sm:$0xff]   ;;  %v1886_v37 = vld [vmem:[#allocation5 + $0x200] ss:$16 sps:$4 sm:$0xff]   ;;  %v88_v21 = vrot.slane %v69_v12, %v2213_v9 }
  0x37   :  { %1093 = vmatprep.subr.bf16.mxu0 %v1863_v20  ;;  %1134 = vmatprep.subr.bf16.mxu1 %v1865_v22  ;;  %v1887_v36 = vld [vmem:[#allocation5 + $0x1e4] ss:$16 sps:$4 sm:$0xff]   ;;  %v1891_v39 = vld [vmem:[#allocation5 + $0x1e0] ss:$16 sps:$4 sm:$0xff]   ;;  %v92_v22 = vrot.slane %v69_v12, %v83_v10 }
  0x38   :  { %v1889_v38 = vld [vmem:[#allocation5 + $0x3e4] ss:$16 sps:$4 sm:$0xff]   ;;  %v1892_v41 = vld [vmem:[#allocation5 + $0x3e0] ss:$16 sps:$4 sm:$0xff]  }
  0x39   :  { %v1893_v40 = vld [vmem:[#allocation5 + $0x1c4] ss:$16 sps:$4 sm:$0xff]   ;;  %v1897_v43 = vld [vmem:[#allocation5 + $0x1c0] ss:$16 sps:$4 sm:$0xff]  }
  0x3a   :  { %1094 = vmatpush1.bf16.msra.mxu0 %v1867_v23  ;;  %1135 = vmatpush1.bf16.msra.mxu1 %v1868_v25  ;;  %v1895_v42 = vld [vmem:[#allocation5 + $0x3c4] ss:$16 sps:$4 sm:$0xff]   ;;  %v1898_v45 = vld [vmem:[#allocation5 + $0x3c0] ss:$16 sps:$4 sm:$0xff]   ;;  %v180_v25 = vrot.slane %v69_v12, %v2215_v13 }
  0x3b   :  { %1095 = vmatprep.subr.bf16.mxu0 %v1869_v24  ;;  %1136 = vmatprep.subr.bf16.mxu1 %v1871_v26  ;;  %v1899_v44 = vld [vmem:[#allocation5 + $0x1a4] ss:$16 sps:$4 sm:$0xff]   ;;  %v1903_v47 = vld [vmem:[#allocation5 + $0x1a0] ss:$16 sps:$4 sm:$0xff]   ;;  %v184_v26 = vrot.slane %v69_v12, %v175_v14 }
  0x3c   :  { %v1901_v46 = vld [vmem:[#allocation5 + $0x3a4] ss:$16 sps:$4 sm:$0xff]   ;;  %v1904_v49 = vld [vmem:[#allocation5 + $0x3a0] ss:$16 sps:$4 sm:$0xff]  }
  0x3d   :  { %v1905_v48 = vld [vmem:[#allocation5 + $0x184] ss:$16 sps:$4 sm:$0xff]   ;;  %v1909_v51 = vld [vmem:[#allocation5 + $0x180] ss:$16 sps:$4 sm:$0xff]  }
  0x3e   :  { %1096 = vmatpush1.bf16.msra.mxu0 %v1873_v27  ;;  %1137 = vmatpush1.bf16.msra.mxu1 %v1874_v29  ;;  %v1907_v50 = vld [vmem:[#allocation5 + $0x384] ss:$16 sps:$4 sm:$0xff]   ;;  %v1910_v53 = vld [vmem:[#allocation5 + $0x380] ss:$16 sps:$4 sm:$0xff]   ;;  %v132_v29 = vrot.slane %v69_v12, %v2217_v15 }
  0x3f   :  { %1097 = vmatprep.subr.bf16.mxu0 %v1875_v28  ;;  %1138 = vmatprep.subr.bf16.mxu1 %v1877_v30  ;;  %v1911_v52 = vld [vmem:[#allocation5 + $0x164] ss:$16 sps:$4 sm:$0xff]   ;;  %v1915_v55 = vld [vmem:[#allocation5 + $0x160] ss:$16 sps:$4 sm:$0xff]   ;;  %v136_v30 = vrot.slane %v69_v12, %v127_v16 }
  0x40   :  { %v1913_v54 = vld [vmem:[#allocation5 + $0x364] ss:$16 sps:$4 sm:$0xff]   ;;  %v1916_v57 = vld [vmem:[#allocation5 + $0x360] ss:$16 sps:$4 sm:$0xff]  }
  0x41   :  { %v1917_v56 = vld [vmem:[#allocation5 + $0x144] ss:$16 sps:$4 sm:$0xff]   ;;  %v1921_v59 = vld [vmem:[#allocation5 + $0x140] ss:$16 sps:$4 sm:$0xff]  }
  0x42   :  { %1098 = vmatpush1.bf16.msra.mxu0 %v1879_v31  ;;  %1139 = vmatpush1.bf16.msra.mxu1 %v1880_v33  ;;  %v1919_v58 = vld [vmem:[#allocation5 + $0x344] ss:$16 sps:$4 sm:$0xff]   ;;  %v1922_v61 = vld [vmem:[#allocation5 + $0x340] ss:$16 sps:$4 sm:$0xff]   ;;  %v228_v33 = vrot.slane %v69_v12, %v2219_v17 }
  0x43   :  { %1099 = vmatprep.subr.bf16.mxu0 %v1881_v32  ;;  %1140 = vmatprep.subr.bf16.mxu1 %v1883_v34  ;;  %v1923_v60 = vld [vmem:[#allocation5 + $0x124] ss:$16 sps:$4 sm:$0xff]   ;;  %v1927_v63 = vld [vmem:[#allocation5 + $0x120] ss:$16 sps:$4 sm:$0xff]   ;;  %v232_v34 = vrot.slane %v69_v12, %v223_v18 }
  0x44   :  { %v1925_v62 = vld [vmem:[#allocation5 + $0x324] ss:$16 sps:$4 sm:$0xff]   ;;  %v1928_v1 = vld [vmem:[#allocation5 + $0x320] ss:$16 sps:$4 sm:$0xff]  }
  0x45   :  { %v1929_v0 = vld [vmem:[#allocation5 + $0x104] ss:$16 sps:$4 sm:$0xff]   ;;  %v1933_v3 = vld [vmem:[#allocation5 + $0x100] ss:$16 sps:$4 sm:$0xff]  }
  0x46   :  { %1100 = vmatpush1.bf16.msra.mxu0 %v1885_v35  ;;  %1141 = vmatpush1.bf16.msra.mxu1 %v1886_v37  ;;  %v1931_v2 = vld [vmem:[#allocation5 + $0x304] ss:$16 sps:$4 sm:$0xff]   ;;  %v1934_v5 = vld [vmem:[#allocation5 + $0x300] ss:$16 sps:$4 sm:$0xff]   ;;  %v108_v37 = vrot.slane %v88_v21, %v2213_v9 }
  0x47   :  { %1101 = vmatprep.subr.bf16.mxu0 %v1887_v36  ;;  %1142 = vmatprep.subr.bf16.mxu1 %v1889_v38  ;;  %v68_v11 = vld [vmem:[#allocation2] sm:$0xff]  ;;  %v112_v38 = vrot.slane %v92_v22, %v2213_v9 }
  0x48   :  { %v80_v19 = vrot.slane %v68_v11, %v2213_v9  ;;  %v84_v20 = vrot.slane %v68_v11, %v83_v10  ;;  %v172_v23 = vrot.slane %v68_v11, %v2215_v13  ;;  %v176_v24 = vrot.slane %v68_v11, %v175_v14 }
  0x49   :  { %v124_v27 = vrot.slane %v68_v11, %v2217_v15  ;;  %v128_v28 = vrot.slane %v68_v11, %v127_v16  ;;  %v220_v31 = vrot.slane %v68_v11, %v2219_v17  ;;  %v224_v32 = vrot.slane %v68_v11, %v223_v18 }
  0x4a   :  { %1102 = vmatpush2.bf16.msra.mxu0 %v1891_v39  ;;  %1143 = vmatpush2.bf16.msra.mxu1 %v1892_v41  ;;  %v100_v35 = vrot.slane %v80_v19, %v2213_v9  ;;  %v104_v36 = vrot.slane %v84_v20, %v2213_v9  ;;  %v192_v41 = vrot.slane %v172_v23, %v2215_v13 }
  0x4b   :  { %1103 = vmatprep.subr.bf16.mxu0 %v1893_v40  ;;  %1144 = vmatprep.subr.bf16.mxu1 %v1895_v42  ;;  %v196_v42 = vrot.slane %v176_v24, %v2215_v13 }
  0x4e   :  { %1104 = vmatpush2.bf16.msra.mxu0 %v1897_v43  ;;  %1145 = vmatpush2.bf16.msra.mxu1 %v1898_v45  ;;  %v200_v43 = vrot.slane %v180_v25, %v2215_v13  ;;  %v144_v45 = vrot.slane %v124_v27, %v2217_v15 }
  0x4f   :  { %1105 = vmatprep.subr.bf16.mxu0 %v1899_v44  ;;  %1146 = vmatprep.subr.bf16.mxu1 %v1901_v46  ;;  %v204_v44 = vrot.slane %v184_v26, %v2215_v13  ;;  %v148_v46 = vrot.slane %v128_v28, %v2217_v15 }
  0x52   :  { %1106 = vmatpush2.bf16.msra.mxu0 %v1903_v47  ;;  %1147 = vmatpush2.bf16.msra.mxu1 %v1904_v49  ;;  %v152_v47 = vrot.slane %v132_v29, %v2217_v15  ;;  %v240_v49 = vrot.slane %v220_v31, %v2219_v17 }
  0x53   :  { %1107 = vmatprep.subr.bf16.mxu0 %v1905_v48  ;;  %1148 = vmatprep.subr.bf16.mxu1 %v1907_v50  ;;  %v156_v48 = vrot.slane %v136_v30, %v2217_v15  ;;  %v244_v50 = vrot.slane %v224_v32, %v2219_v17 }
  0x56   :  { %1108 = vmatpush2.bf16.msra.mxu0 %v1909_v51  ;;  %1149 = vmatpush2.bf16.msra.mxu1 %v1910_v53  ;;  %v248_v51 = vrot.slane %v228_v33, %v2219_v17 }
  0x57   :  { %1109 = vmatprep.subr.bf16.mxu0 %v1911_v52  ;;  %1150 = vmatprep.subr.bf16.mxu1 %v1913_v54  ;;  %v252_v52 = vrot.slane %v232_v34, %v2219_v17 }
  0x5a   :  { %1110 = vmatpush2.bf16.msra.mxu0 %v1915_v55  ;;  %1151 = vmatpush2.bf16.msra.mxu1 %v1916_v57 }
  0x5b   :  { %1111 = vmatprep.subr.bf16.mxu0 %v1917_v56  ;;  %1152 = vmatprep.subr.bf16.mxu1 %v1919_v58 }
  0x5e   :  { %1112 = vmatpush2.bf16.msra.mxu0 %v1921_v59  ;;  %1153 = vmatpush2.bf16.msra.mxu1 %v1922_v61 }
  0x5f   :  { %1113 = vmatprep.subr.bf16.mxu0 %v1923_v60  ;;  %1154 = vmatprep.subr.bf16.mxu1 %v1925_v62 }
  0x62   :  { %1114 = vmatpush2.bf16.msra.mxu0 %v1927_v63  ;;  %1155 = vmatpush2.bf16.msra.mxu1 %v1928_v1 }
  0x63   :  { %1115 = vmatprep.subr.bf16.mxu0 %v1929_v0  ;;  %1156 = vmatprep.subr.bf16.mxu1 %v1931_v2 }
  0x66   :  { %1116 = vmatpush2.bf16.msra.mxu0 %v1933_v3  ;;  %1157 = vmatpush2.bf16.msra.mxu1 %v1934_v5  ;;  %v261_v3 = vld [vmem:[%s2275_s2] sm:$0xf] }
  0x67   :  { %1167 = vmatprep.subr.bf16.mxu0 %v1937_v4  ;;  %1208 = vmatprep.subr.bf16.mxu1 %v1940_v6  ;;  %v270_v14 = vrot.slane %v261_v3, %v2217_v15  ;;  %v278_v16 = vrot.slane %v261_v3, %v2219_v17  ;;  %v266_v18 = vrot.slane %v261_v3, %v2213_v9 }
  0x68   :  { %v274_v19 = vrot.slane %v261_v3, %v2215_v13  ;;  %v1982_v3 = vld [vmem:[#allocation5 + $0x20c] ss:$16 sps:$4 sm:$0xff]  }
  0xa3   :  { %v73_v39 = vpop.permute.xlu0 %72  ;;  %v167_v40 = vpop.permute.xlu1 %166 }
  0xa4   :  { %v113_v53 = vmul.f32 %v100_v35, %v73_v39  ;;  %v114_v54 = vmul.f32 %v104_v36, %v73_v39  ;;  %v115_v55 = vmul.f32 %v108_v37, %v73_v39  ;;  %v116_v56 = vmul.f32 %v112_v38, %v73_v39  ;;  %v1935_v38 = vld [vmem:[#allocation5 + $0xe8] ss:$16 sps:$4 sm:$0xff]  }
  0xa5   :  { %v205_v57 = vmul.f32 %v192_v41, %v167_v40  ;;  %v206_v58 = vmul.f32 %v196_v42, %v167_v40  ;;  %v207_v59 = vmul.f32 %v200_v43, %v167_v40  ;;  %v208_v60 = vmul.f32 %v204_v44, %v167_v40  ;;  %v1938_v39 = vld [vmem:[#allocation5 + $0x2e8] ss:$16 sps:$4 sm:$0xff]   ;;  %v1943_v42 = vld [vmem:[#allocation5 + $0xcc] ss:$16 sps:$4 sm:$0xff]  }
  0xa6   :  { %v1946_v43 = vld [vmem:[#allocation5 + $0x2cc] ss:$16 sps:$4 sm:$0xff]   ;;  %v1941_v44 = vld [vmem:[#allocation5 + $0xc8] ss:$16 sps:$4 sm:$0xff]  }
  0xa8   :  { %v119_v61 = vpop.permute.xlu0 %118  ;;  %v215_v62 = vpop.permute.xlu1 %214 }
  0xa9   :  { %v157_v63 = vmul.f32 %v144_v45, %v119_v61  ;;  %v158_v0 = vmul.f32 %v148_v46, %v119_v61  ;;  %v159_v1 = vmul.f32 %v152_v47, %v119_v61  ;;  %v160_v2 = vmul.f32 %v156_v48, %v119_v61  ;;  %v1944_v45 = vld [vmem:[#allocation5 + $0x2c8] ss:$16 sps:$4 sm:$0xff]   ;;  %v1949_v46 = vld [vmem:[#allocation5 + $0xac] ss:$16 sps:$4 sm:$0xff]  }
  0xaa   :  { %v253_v4 = vmul.f32 %v240_v49, %v215_v62  ;;  %v254_v5 = vmul.f32 %v244_v50, %v215_v62  ;;  %v255_v6 = vmul.f32 %v248_v51, %v215_v62  ;;  %v256_v7 = vmul.f32 %v252_v52, %v215_v62  ;;  %v1952_v47 = vld [vmem:[#allocation5 + $0x2ac] ss:$16 sps:$4 sm:$0xff]   ;;  %v1947_v48 = vld [vmem:[#allocation5 + $0xa8] ss:$16 sps:$4 sm:$0xff]  }
  0xab   :  { %v161_v8 = vadd.f32 %v157_v63, %v113_v53  ;;  %v162_v10 = vadd.f32 %v158_v0, %v114_v54  ;;  %v163_v11 = vadd.f32 %v159_v1, %v115_v55  ;;  %v164_v12 = vadd.f32 %v160_v2, %v116_v56  ;;  %v1950_v49 = vld [vmem:[#allocation5 + $0x2a8] ss:$16 sps:$4 sm:$0xff]   ;;  %v1955_v50 = vld [vmem:[#allocation5 + $0x8c] ss:$16 sps:$4 sm:$0xff]  }
  0xac   :  { %v1958_v51 = vld [vmem:[#allocation5 + $0x28c] ss:$16 sps:$4 sm:$0xff]   ;;  %v1953_v52 = vld [vmem:[#allocation5 + $0x88] ss:$16 sps:$4 sm:$0xff]  }
  0xad   :  { %v209_v20 = vadd.f32 %v205_v57, %v161_v8  ;;  %v211_v21 = vadd.f32 %v207_v59, %v163_v11  ;;  %v210_v22 = vadd.f32 %v206_v58, %v162_v10  ;;  %v212_v23 = vadd.f32 %v208_v60, %v164_v12  ;;  %v1956_v53 = vld [vmem:[#allocation5 + $0x288] ss:$16 sps:$4 sm:$0xff]   ;;  %v1961_v54 = vld [vmem:[#allocation5 + $0x6c] ss:$16 sps:$4 sm:$0xff]  }
  0xae   :  { %v1964_v55 = vld [vmem:[#allocation5 + $0x26c] ss:$16 sps:$4 sm:$0xff]   ;;  %v1959_v56 = vld [vmem:[#allocation5 + $0x68] ss:$16 sps:$4 sm:$0xff]  }
  0xaf   :  { %v257_v24 = vadd.f32 %v253_v4, %v209_v20  ;;  %v259_v25 = vadd.f32 %v255_v6, %v211_v21  ;;  %v258_v26 = vadd.f32 %v254_v5, %v210_v22  ;;  %v260_v27 = vadd.f32 %v256_v7, %v212_v23  ;;  %v1962_v57 = vld [vmem:[#allocation5 + $0x268] ss:$16 sps:$4 sm:$0xff]   ;;  %v1967_v58 = vld [vmem:[#allocation5 + $0x4c] ss:$16 sps:$4 sm:$0xff]  }
  0xb0   :  { %v1970_v59 = vld [vmem:[#allocation5 + $0x24c] ss:$16 sps:$4 sm:$0xff]   ;;  %v1965_v60 = vld [vmem:[#allocation5 + $0x48] ss:$16 sps:$4 sm:$0xff]  }
  0xb1   :  { %v284_v28 = vadd.f32 %v270_v14, %v258_v26  ;;  %v286_v29 = vadd.f32 %v278_v16, %v260_v27  ;;  %v283_v30 = vadd.f32 %v266_v18, %v257_v24  ;;  %v285_v31 = vadd.f32 %v274_v19, %v259_v25  ;;  %v1968_v61 = vld [vmem:[#allocation5 + $0x248] ss:$16 sps:$4 sm:$0xff]   ;;  %v1973_v62 = vld [vmem:[#allocation5 + $0x2c] ss:$16 sps:$4 sm:$0xff]  }
  0xb2   :  { %v1976_v63 = vld [vmem:[#allocation5 + $0x22c] ss:$16 sps:$4 sm:$0xff]   ;;  %v1971_v0 = vld [vmem:[#allocation5 + $0x28] ss:$16 sps:$4 sm:$0xff]  }
  0xb3   :  { %v288_v32 = vmax.f32 %v284_v28, 0.0  ;;  %v290_v33 = vmax.f32 %v286_v29, 0.0  ;;  %v287_v34 = vmax.f32 %v283_v30, 0.0  ;;  %v289_v35 = vmax.f32 %v285_v31, 0.0  ;;  %v1974_v1 = vld [vmem:[#allocation5 + $0x228] ss:$16 sps:$4 sm:$0xff]  }
  0xb4   :  { %v1979_v2 = vld [vmem:[#allocation5 + $0xc] ss:$16 sps:$4 sm:$0xff]   ;;  %v1977_v4 = vld [vmem:[#allocation5 + $0x8] ss:$16 sps:$4 sm:$0xff]  }
  0xb5   :  { %v292_v36 = vpack.c.bf16 %v288_v32, %v288_v32  ;;  %v294_v37 = vpack.c.bf16 %v290_v33, %v290_v33  ;;  %v2252_v40 = vpack.c.bf16 %v287_v34, %v287_v34  ;;  %v2254_v41 = vpack.c.bf16 %v289_v35, %v289_v35  ;;  %v1980_v5 = vld [vmem:[#allocation5 + $0x208] ss:$16 sps:$4 sm:$0xff]   ;;  %v1985_v6 = vld [vmem:[#allocation5 + $0x1ec] ss:$16 sps:$4 sm:$0xff]  }
  0xb6   :  { %v1988_v7 = vld [vmem:[#allocation5 + $0x3ec] ss:$16 sps:$4 sm:$0xff]   ;;  %v1983_v8 = vld [vmem:[#allocation5 + $0x1e8] ss:$16 sps:$4 sm:$0xff]  }
  0xb7   :  { %1117 = vmatprep.mubr.bf16.mxu0 %v292_v36  ;;  %1158 = vmatprep.mubr.bf16.mxu1 %v294_v37  ;;  %v1986_v10 = vld [vmem:[#allocation5 + $0x3e8] ss:$16 sps:$4 sm:$0xff]   ;;  %v1991_v11 = vld [vmem:[#allocation5 + $0x1cc] ss:$16 sps:$4 sm:$0xff]  }
  0xb8   :  { %1118 = vmatmul.mubr.bf16.vlgmr.msra.gmra.mxu0 %v2252_v40  ;;  %1159 = vmatmul.mubr.bf16.vlgmr.msra.gmra.mxu1 %v2254_v41  ;;  %v1994_v12 = vld [vmem:[#allocation5 + $0x3cc] ss:$16 sps:$4 sm:$0xff]   ;;  %v1989_v14 = vld [vmem:[#allocation5 + $0x1c8] ss:$16 sps:$4 sm:$0xff]  }
  0xb9   :  { %1168 = vmatpush1.bf16.msra.mxu0 %v1935_v38  ;;  %1209 = vmatpush1.bf16.msra.mxu1 %v1938_v39  ;;  %v1992_v16 = vld [vmem:[#allocation5 + $0x3c8] ss:$16 sps:$4 sm:$0xff]   ;;  %v1997_v18 = vld [vmem:[#allocation5 + $0x1ac] ss:$16 sps:$4 sm:$0xff]  }
  0xba   :  { %1199 = vmatprep.mubr.bf16.mxu0 %v292_v36  ;;  %1240 = vmatprep.mubr.bf16.mxu1 %v294_v37  ;;  %v2000_v19 = vld [vmem:[#allocation5 + $0x3ac] ss:$16 sps:$4 sm:$0xff]   ;;  %v1995_v20 = vld [vmem:[#allocation5 + $0x1a8] ss:$16 sps:$4 sm:$0xff]  }
  0xbb   :  { %1169 = vmatprep.subr.bf16.mxu0 %v1943_v42  ;;  %1210 = vmatprep.subr.bf16.mxu1 %v1946_v43  ;;  %v1998_v21 = vld [vmem:[#allocation5 + $0x3a8] ss:$16 sps:$4 sm:$0xff]   ;;  %v2003_v22 = vld [vmem:[#allocation5 + $0x18c] ss:$16 sps:$4 sm:$0xff]  }
  0xbc   :  { %v2006_v23 = vld [vmem:[#allocation5 + $0x38c] ss:$16 sps:$4 sm:$0xff]   ;;  %v2001_v24 = vld [vmem:[#allocation5 + $0x188] ss:$16 sps:$4 sm:$0xff]  }
  0xbd   :  { %1170 = vmatpush1.bf16.msra.mxu0 %v1941_v44  ;;  %1211 = vmatpush1.bf16.msra.mxu1 %v1944_v45  ;;  %v2004_v25 = vld [vmem:[#allocation5 + $0x388] ss:$16 sps:$4 sm:$0xff]   ;;  %v2009_v26 = vld [vmem:[#allocation5 + $0x16c] ss:$16 sps:$4 sm:$0xff]  }
  0xbe   :  { %1171 = vmatprep.subr.bf16.mxu0 %v1949_v46  ;;  %1212 = vmatprep.subr.bf16.mxu1 %v1952_v47  ;;  %v2012_v27 = vld [vmem:[#allocation5 + $0x36c] ss:$16 sps:$4 sm:$0xff]   ;;  %v2007_v28 = vld [vmem:[#allocation5 + $0x168] ss:$16 sps:$4 sm:$0xff]   ;;  %v2033_v46 = vld [vmem:[#allocation7 + $0x70] sm:$0xff]  }
  0xbf   :  { %v2010_v29 = vld [vmem:[#allocation5 + $0x368] ss:$16 sps:$4 sm:$0xff]   ;;  %v2015_v30 = vld [vmem:[#allocation5 + $0x14c] ss:$16 sps:$4 sm:$0xff]   ;;  %v2034_v47 = vld [vmem:[#allocation7 + $0x30] sm:$0xff]  }
  0xc0   :  { %v2018_v31 = vld [vmem:[#allocation5 + $0x34c] ss:$16 sps:$4 sm:$0xff]   ;;  %v2013_v32 = vld [vmem:[#allocation5 + $0x148] ss:$16 sps:$4 sm:$0xff]  }
  0xc1   :  { %1172 = vmatpush1.bf16.msra.mxu0 %v1947_v48  ;;  %1213 = vmatpush1.bf16.msra.mxu1 %v1950_v49  ;;  %v2016_v33 = vld [vmem:[#allocation5 + $0x348] ss:$16 sps:$4 sm:$0xff]   ;;  %v2021_v34 = vld [vmem:[#allocation5 + $0x12c] ss:$16 sps:$4 sm:$0xff]  }
  0xc2   :  { %1173 = vmatprep.subr.bf16.mxu0 %v1955_v50  ;;  %1214 = vmatprep.subr.bf16.mxu1 %v1958_v51  ;;  %v2024_v35 = vld [vmem:[#allocation5 + $0x32c] ss:$16 sps:$4 sm:$0xff]   ;;  %v2019_v36 = vld [vmem:[#allocation5 + $0x128] ss:$16 sps:$4 sm:$0xff]   ;;  %v2037_v50 = vld [vmem:[#allocation7 + $0x60] sm:$0xff]  }
  0xc3   :  { %v2022_v37 = vld [vmem:[#allocation5 + $0x328] ss:$16 sps:$4 sm:$0xff]   ;;  %v2027_v38 = vld [vmem:[#allocation5 + $0x10c] ss:$16 sps:$4 sm:$0xff]   ;;  %v2038_v51 = vld [vmem:[#allocation7 + $0x20] sm:$0xff]  }
  0xc4   :  { %v2030_v39 = vld [vmem:[#allocation5 + $0x30c] ss:$16 sps:$4 sm:$0xff]   ;;  %v2025_v42 = vld [vmem:[#allocation5 + $0x108] ss:$16 sps:$4 sm:$0xff]  }
  0xc5   :  { %1174 = vmatpush1.bf16.msra.mxu0 %v1953_v52  ;;  %1215 = vmatpush1.bf16.msra.mxu1 %v1956_v53  ;;  %v2028_v43 = vld [vmem:[#allocation5 + $0x308] ss:$16 sps:$4 sm:$0xff]  }
  0xc6   :  { %1175 = vmatprep.subr.bf16.mxu0 %v1961_v54  ;;  %1216 = vmatprep.subr.bf16.mxu1 %v1964_v55  ;;  %v2031_v44 = vld [vmem:[#allocation7 + $0x78] sm:$0xff]   ;;  %v2035_v48 = vld [vmem:[#allocation7 + $0x68] sm:$0xff]   ;;  %v2049_v55 = vld [vmem:[#allocation7 + $0xf0] sm:$0xff]  }
  0xc7   :  { %v2032_v45 = vld [vmem:[#allocation7 + $0x38] sm:$0xff]   ;;  %v2036_v49 = vld [vmem:[#allocation7 + $0x28] sm:$0xff]  }
  0xc8   :  { %v2039_v52 = vld [vmem:[#allocation7 + $0x58] sm:$0xff]  }
  0xc9   :  { %1176 = vmatpush1.bf16.msra.mxu0 %v1959_v56  ;;  %1217 = vmatpush1.bf16.msra.mxu1 %v1962_v57  ;;  %v2047_v53 = vld [vmem:[#allocation7 + $0xf8] sm:$0xff]   ;;  %v2051_v57 = vld [vmem:[#allocation7 + $0xe8] sm:$0xff]  }
  0xca   :  { %1177 = vmatprep.subr.bf16.mxu0 %v1967_v58  ;;  %1218 = vmatprep.subr.bf16.mxu1 %v1970_v59  ;;  %v2048_v54 = vld [vmem:[#allocation7 + $0xb8] sm:$0xff]   ;;  %v2042_v58 = vld [vmem:[#allocation7 + $0x10] sm:$0xff]   ;;  %v2043_v59 = vld [vmem:[#allocation7 + $0x48] sm:$0xff]  }
  0xcb   :  { %v2040_v56 = vld [vmem:[#allocation7 + $0x18] sm:$0xff]  }
  0xcd   :  { %1178 = vmatpush1.bf16.msra.mxu0 %v1965_v60  ;;  %1219 = vmatpush1.bf16.msra.mxu1 %v1968_v61  ;;  %v2052_v60 = vld [vmem:[#allocation7 + $0xa8] sm:$0xff]   ;;  %v2053_v61 = vld [vmem:[#allocation7 + $0xe0] sm:$0xff]  }
  0xce   :  { %1179 = vmatprep.subr.bf16.mxu0 %v1973_v62  ;;  %1220 = vmatprep.subr.bf16.mxu1 %v1976_v63  ;;  %v2044_v62 = vld [vmem:[#allocation7 + $0x8] sm:$0xff]   ;;  %v2045_v63 = vld [vmem:[#allocation7 + $0x40] sm:$0xff]  }
  0xd1   :  { %1180 = vmatpush1.bf16.msra.mxu0 %v1971_v0  ;;  %1221 = vmatpush1.bf16.msra.mxu1 %v1974_v1  ;;  %v2054_v0 = vld [vmem:[#allocation7 + $0xa0] sm:$0xff]   ;;  %v2055_v1 = vld [vmem:[#allocation7 + $0xd8] sm:$0xff]  }
  0xd2   :  { %1181 = vmatprep.subr.bf16.mxu0 %v1979_v2  ;;  %1222 = vmatprep.subr.bf16.mxu1 %v1982_v3  ;;  %v2046_v2 = vld [vmem:[#allocation7] sm:$0xff]   ;;  %v2056_v3 = vld [vmem:[#allocation7 + $0x98] sm:$0xff]  }
  0xd5   :  { %1182 = vmatpush1.bf16.msra.mxu0 %v1977_v4  ;;  %1223 = vmatpush1.bf16.msra.mxu1 %v1980_v5  ;;  %v2057_v4 = vld [vmem:[#allocation7 + $0xd0] sm:$0xff]  }
  0xd6   :  { %1183 = vmatprep.subr.bf16.mxu0 %v1985_v6  ;;  %1224 = vmatprep.subr.bf16.mxu1 %v1988_v7  ;;  %v2058_v5 = vld [vmem:[#allocation7 + $0x90] sm:$0xff]   ;;  %v2059_v6 = vld [vmem:[#allocation7 + $0xc8] sm:$0xff]  }
  0xd7   :  { %v2060_v7 = vld [vmem:[#allocation7 + $0x88] sm:$0xff]  }
  0xd9   :  { %1184 = vmatpush2.bf16.msra.mxu0 %v1983_v8  ;;  %1225 = vmatpush2.bf16.msra.mxu1 %v1986_v10  ;;  %v2061_v8 = vld [vmem:[#allocation7 + $0xc0] sm:$0xff]  }
  0xda   :  { %1185 = vmatprep.subr.bf16.mxu0 %v1991_v11  ;;  %1226 = vmatprep.subr.bf16.mxu1 %v1994_v12  ;;  %v2062_v10 = vld [vmem:[#allocation7 + $0x80] sm:$0xff]   ;;  %v423_v11 = vld [vmem:[%s2277_s4] sm:$0xf] }
  0xdb   :  { %v428_v12 = vrot.slane %v423_v11, %v2213_v9  ;;  %v436_v9 = vrot.slane %v423_v11, %v2215_v13 }
  0xdd   :  { %1186 = vmatpush2.bf16.msra.mxu0 %v1989_v14  ;;  %1227 = vmatpush2.bf16.msra.mxu1 %v1992_v16  ;;  %v432_v14 = vrot.slane %v423_v11, %v2217_v15  ;;  %v440_v15 = vrot.slane %v423_v11, %v2219_v17 }
  0xde   :  { %1187 = vmatprep.subr.bf16.mxu0 %v1997_v18  ;;  %1228 = vmatprep.subr.bf16.mxu1 %v2000_v19 }
  0xe1   :  { %1188 = vmatpush2.bf16.msra.mxu0 %v1995_v20  ;;  %1229 = vmatpush2.bf16.msra.mxu1 %v1998_v21 }
  0xe2   :  { %1189 = vmatprep.subr.bf16.mxu0 %v2003_v22  ;;  %1230 = vmatprep.subr.bf16.mxu1 %v2006_v23 }
  0xe5   :  { %1190 = vmatpush2.bf16.msra.mxu0 %v2001_v24  ;;  %1231 = vmatpush2.bf16.msra.mxu1 %v2004_v25 }
  0xe6   :  { %1191 = vmatprep.subr.bf16.mxu0 %v2009_v26  ;;  %1232 = vmatprep.subr.bf16.mxu1 %v2012_v27 }
  0xe9   :  { %1192 = vmatpush2.bf16.msra.mxu0 %v2007_v28  ;;  %1233 = vmatpush2.bf16.msra.mxu1 %v2010_v29 }
  0xea   :  { %1193 = vmatprep.subr.bf16.mxu0 %v2015_v30  ;;  %1234 = vmatprep.subr.bf16.mxu1 %v2018_v31 }
  0xed   :  { %1194 = vmatpush2.bf16.msra.mxu0 %v2013_v32  ;;  %1235 = vmatpush2.bf16.msra.mxu1 %v2016_v33 }
  0xee   :  { %1195 = vmatprep.subr.bf16.mxu0 %v2021_v34  ;;  %1236 = vmatprep.subr.bf16.mxu1 %v2024_v35 }
  0xf1   :  { %1196 = vmatpush2.bf16.msra.mxu0 %v2019_v36  ;;  %1237 = vmatpush2.bf16.msra.mxu1 %v2022_v37 }
  0xf2   :  { %1197 = vmatprep.subr.bf16.mxu0 %v2027_v38  ;;  %1238 = vmatprep.subr.bf16.mxu1 %v2030_v39 }
  0xf5   :  { %1198 = vmatpush2.bf16.msra.mxu0 %v2025_v42  ;;  %1239 = vmatpush2.bf16.msra.mxu1 %v2028_v43 }
  0xf6   :  { %1778 = vmatprep.subr.bf16.mxu0 %v2031_v44  ;;  %1800 = vmatprep.subr.bf16.mxu1 %v2047_v53 }
  0xf8   :  { %1200 = vmatmul.mubr.bf16.vlgmr.msra.gmra.mxu0 %v2252_v40  ;;  %1241 = vmatmul.mubr.bf16.vlgmr.msra.gmra.mxu1 %v2254_v41  ;;  %v2041_v40 = vld [vmem:[#allocation7 + $0x50] sm:$0xff]  }
  0xf9   :  { %1779 = vmatpush3.bf16.msra.mxu0 %v2032_v45  ;;  %1801 = vmatpush3.bf16.msra.mxu1 %v2048_v54  ;;  %v2050_v41 = vld [vmem:[#allocation7 + $0xb0] sm:$0xff]  }
  0xfa   :  { %1780 = vmatprep.subr.bf16.mxu0 %v2033_v46  ;;  %1802 = vmatprep.subr.bf16.mxu1 %v2049_v55  ;;  %v1745_v54 = vld [vmem:[%s2279_s6] ss:$0 sm:$0xff] }
  0xfd   :  { %1781 = vmatpush3.bf16.msra.mxu0 %v2034_v47  ;;  %1803 = vmatpush3.bf16.msra.mxu1 %v2050_v41 }
  0xfe   :  { %1782 = vmatprep.subr.bf16.mxu0 %v2035_v48  ;;  %1804 = vmatprep.subr.bf16.mxu1 %v2051_v57 }
 0x101   :  { %1783 = vmatpush3.bf16.msra.mxu0 %v2036_v49  ;;  %1805 = vmatpush3.bf16.msra.mxu1 %v2052_v60 }
 0x102   :  { %1784 = vmatprep.subr.bf16.mxu0 %v2037_v50  ;;  %1806 = vmatprep.subr.bf16.mxu1 %v2053_v61 }
 0x105   :  { %1785 = vmatpush3.bf16.msra.mxu0 %v2038_v51  ;;  %1807 = vmatpush3.bf16.msra.mxu1 %v2054_v0 }
 0x106   :  { %1786 = vmatprep.subr.bf16.mxu0 %v2039_v52  ;;  %1808 = vmatprep.subr.bf16.mxu1 %v2055_v1 }
 0x109   :  { %1787 = vmatpush3.bf16.msra.mxu0 %v2040_v56  ;;  %1809 = vmatpush3.bf16.msra.mxu1 %v2056_v3 }
 0x10a   :  { %1788 = vmatprep.subr.bf16.mxu0 %v2041_v40  ;;  %1810 = vmatprep.subr.bf16.mxu1 %v2057_v4 }
 0x10d   :  { %1789 = vmatpush3.bf16.msra.mxu0 %v2042_v58  ;;  %1811 = vmatpush3.bf16.msra.mxu1 %v2058_v5 }
 0x10e   :  { %1790 = vmatprep.subr.bf16.mxu0 %v2043_v59  ;;  %1812 = vmatprep.subr.bf16.mxu1 %v2059_v6 }
 0x111   :  { %1791 = vmatpush3.bf16.msra.mxu0 %v2044_v62  ;;  %1813 = vmatpush3.bf16.msra.mxu1 %v2060_v7 }
 0x112   :  { %1792 = vmatprep.subr.bf16.mxu0 %v2045_v63  ;;  %1814 = vmatprep.subr.bf16.mxu1 %v2061_v8 }
 0x115   :  { %1793 = vmatpush3.bf16.msra.mxu0 %v2046_v2  ;;  %1815 = vmatpush3.bf16.msra.mxu1 %v2062_v10 }
 0x178   :  { %v1119_v16 = vpop.f32.mrf.mxu0  ;;  %v1160_v18 = vpop.f32.mrf.mxu1 }
 0x179   :  { %v1120_v19 = vadd.f32 %v1119_v16, %v428_v12 }
 0x17a   :  { %v1121_v20 = vpop.f32.mrf.mxu0  ;;  %v1162_v21 = vpop.f32.mrf.mxu1 }
 0x17b   :  { %v1161_v22 = vadd.f32 %v1160_v18, %v1120_v19  ;;  %v1122_v23 = vadd.f32 %v1121_v20, %v432_v14 }
 0x17c   :  { %v1123_v24 = vpop.f32.mrf.mxu0  ;;  %v1164_v25 = vpop.f32.mrf.mxu1 }
 0x17d   :  { %v1163_v26 = vadd.f32 %v1162_v21, %v1122_v23  ;;  %v1249_v27 = vmax.f32 %v1161_v22, 0.0 }
 0x17e   :  { %v1124_v28 = vpop.f32.mrf.mxu0  ;;  %v1165_v29 = vpop.f32.mrf.mxu1 }
 0x17f   :  { %v1250_v30 = vmax.f32 %v1163_v26, 0.0  ;;  %v1253_v32 = vpack.c.bf16 %v1249_v27, %v1249_v27 }
 0x181   :  { %v1254_v31 = vpack.c.bf16 %v1250_v30, %v1250_v30 }
 0x183   :  { %1552 = vmatprep.mubr.bf16.mxu0 %v1254_v31 }
 0x184   :  { %1553 = vmatmul.mubr.bf16.vlgmr.msra.gmra.mxu0 %v1253_v32 }
 0x1b8   :  { %v1201_v33 = vpop.f32.mrf.mxu0  ;;  %v1242_v34 = vpop.f32.mrf.mxu1 }
 0x1b9   :  { %v1202_v35 = vadd.f32 %v1201_v33, %v436_v9 }
 0x1ba   :  { %v1203_v36 = vpop.f32.mrf.mxu0  ;;  %v1244_v37 = vpop.f32.mrf.mxu1 }
 0x1bb   :  { %v1243_v38 = vadd.f32 %v1242_v34, %v1202_v35  ;;  %v1204_v39 = vadd.f32 %v1203_v36, %v440_v15 }
 0x1bc   :  { %v1205_v42 = vpop.f32.mrf.mxu0  ;;  %v1246_v43 = vpop.f32.mrf.mxu1 }
 0x1bd   :  { %v1245_v44 = vadd.f32 %v1244_v37, %v1204_v39  ;;  %v1251_v45 = vmax.f32 %v1243_v38, 0.0 }
 0x1be   :  { %v1206_v46 = vpop.f32.mrf.mxu0  ;;  %v1247_v47 = vpop.f32.mrf.mxu1 }
 0x1bf   :  { %v1252_v48 = vmax.f32 %v1245_v44, 0.0  ;;  %v1255_v50 = vpack.c.bf16 %v1251_v45, %v1251_v45 }
 0x1c1   :  { %v1256_v49 = vpack.c.bf16 %v1252_v48, %v1252_v48 }
 0x1c3   :  { %1592 = vmatprep.mubr.bf16.mxu1 %v1256_v49 }
 0x1c4   :  { %1593 = vmatmul.mubr.bf16.vlgmr.msra.gmra.mxu1 %v1255_v50 }
 0x244   :  { %v1794_v13 = vpop.f32.mrf.mxu0 }
 0x246   :  { %v1795_v17 = vpop.f32.mrf.mxu0 }
 0x247   :  { %v1796_v53 = vadd.f32 %v1795_v17, %v1794_v13 }
 0x248   :  { %v1797_v51 = vpop.f32.mrf.mxu0 }
 0x249   :  { %v1555_v40 = vadd.f32 %v1796_v53, %v1745_v54 }
 0x24a   :  { %v1798_v52 = vpop.f32.mrf.mxu0 }
 0x284   :  { %v1816_v55 = vpop.f32.mrf.mxu1 }
 0x286   :  { %v1817_v56 = vpop.f32.mrf.mxu1 }
 0x287   :  { %v1818_v41 = vadd.f32 %v1817_v56, %v1816_v55 }
 0x288   :  { %v1819_v57 = vpop.f32.mrf.mxu1 }
 0x289   :  { %v1595_v58 = vadd.f32 %v1818_v41, %v1555_v40 }
 0x28a   :  { %v1820_v59 = vpop.f32.mrf.mxu1 }
 0x28b   :  { %1600 = vst [vmem:[#allocation8] sm:$0xff] %v1595_v58 }
 0x28c   :  { %2134 = shalt.err (!%p2131_p5)
}
 0x28d   :  { %1610 = dma.vmem_to_hbm [thread:$0]  %s1608_s23, 128, %s2280_s7, [#allocation4]  }
 0x28e   :  { %2147 = dma.done.wait [#allocation4], 128  }
 0x28f   :  { %2148 = vsyncadd [#allocation4], 4294967168 }
 0x290   :  { %1614 = vsyncpa [#allocation3], 1 }
 0x291   :  { %1615 = vsyncpa [#allocation6], 1 }
 0x292   :  { %1616 = vsyncpa [#allocation4], 1 }

</bundles_post_ra>
